<compile_context>
chip_gen: v7x
topology: tpu7x:2x2x1
jax: 0.10.0
libtpu: 0.0.40
codegen_flags: <defaults>
</compile_context>

<pallas_src>
import math

import jax
import jax.numpy as jnp
from jax.experimental import pallas as pl
from jax.experimental.pallas import tpu as pltpu  # noqa: F401  (TPU backend import)


_HALF_PLUS_HALF_LOG_2PI = 0.5 + 0.5 * math.log(2.0 * math.pi)
_LANE = 128


def _softplus(x):
    # Match F.softplus(x, beta=1, threshold=20): identity above threshold,
    # log1p(exp(x)) otherwise (the minimum() guard keeps exp() safe).
    return jnp.where(x > 20.0, x, jnp.log1p(jnp.exp(jnp.minimum(x, 20.0))))


def _softplus_std_kernel(stddev_ref, std_ref):
    # Single lane-dense row: one vector load, VPU/EUP softplus, one unmasked
    # vector store.  All math stays in the parameter dtype (f32).
    std_ref[...] = _softplus(stddev_ref[...])


def separate_std_gaussian_forward(x, stddev_param):
    """Forward of SeparateStdGaussianDist.

    x: (B, A) network output (the mean), stddev_param: (A,) f32 parameter.

    Returns (mean, std, entropy):
      mean    : (B, A) == x                  (identity pass-through, no kernel work)
      std     : (A,)   == softplus(stddev)   (state-independent row, from the kernel)
      entropy : (B,)   == Normal(mean, std).entropy().sum(-1)  (batch-independent,
                computed wrapper-side from std so XLA fuses it)
    """
    B, A = x.shape
    param_dtype = stddev_param.dtype

    # Lane-dense padded row: (1, 128*k).  Padded lanes hold zeros and are
    # sliced away after the call; they never enter the entropy computation.
    a_pad = _LANE * ((A + _LANE - 1) // _LANE)
    stddev_row = jnp.zeros((1, a_pad), dtype=param_dtype).at[0, :A].set(stddev_param)

    std_row = pl.pallas_call(
        _softplus_std_kernel,
        out_shape=jax.ShapeDtypeStruct((1, a_pad), param_dtype),
        in_specs=[pl.BlockSpec((1, a_pad), lambda: (0, 0))],
        out_specs=pl.BlockSpec((1, a_pad), lambda: (0, 0)),
        cost_estimate=pl.CostEstimate(
            flops=3 * a_pad,
            transcendentals=2 * a_pad,
            bytes_accessed=8 * a_pad,
        ),
    )(stddev_row)

    mean = x                                   # identity pass-through
    std = std_row[0, :A]                       # (A,) in param dtype (f32)

    # Batch-independent Gaussian entropy summed over the action dim, fused by
    # XLA with the slice above and the broadcast below.
    ent_scalar = A * _HALF_PLUS_HALF_LOG_2PI + jnp.sum(jnp.log(std))
    entropy = jnp.broadcast_to(ent_scalar, (B,))
    return mean, std, entropy


if __name__ == "__main__":
    key = jax.random.PRNGKey(0)

    batch, action_dim = 8, 6
    x = jax.random.normal(key, (batch, action_dim), dtype=jnp.float32)

    # nn.Parameter(device.zeros(action_dim)) -> zeros init, exactly as in __init__.
    stddev_param = jnp.zeros((action_dim,), dtype=jnp.float32)

    mean, std, entropy = separate_std_gaussian_forward(x, stddev_param)
    jax.block_until_ready((mean, std, entropy))

    # Pure-JAX reference check (distribution parameters + entropy).
    std_ref = jax.nn.softplus(stddev_param)                            # (A,)
    std_bcast_ref = jnp.broadcast_to(std_ref[None, :], x.shape)        # (B, A)
    ent_ref = jnp.sum(0.5 + 0.5 * jnp.log(2.0 * jnp.pi) + jnp.log(std_bcast_ref),
                      axis=-1)                                         # (B,)

    assert mean.shape == x.shape and jnp.allclose(mean, x, atol=1e-6), "mean mismatch"
    assert std.shape == (action_dim,) and jnp.allclose(std, std_ref, atol=1e-6), \
        "std mismatch"
    assert entropy.shape == (batch,) and jnp.allclose(entropy, ent_ref, atol=1e-5), \
        "entropy mismatch"

    print("KERNEL_OK")
</pallas_src>

<mosaic_0001>
module attributes {stable_mosaic.version = 11 : i64} {
  func.func @_softplus_std_kernel(%arg0: memref<1x128xf32, #tpu.memory_space<vmem>>, %arg1: memref<1x128xf32, #tpu.memory_space<vmem>>) attributes {dimension_semantics = [], scalar_prefetch = 0 : i64, scratch_operands = 0 : i64, tpu.core_type = #tpu.core_type<tc>} {
    %c0 = arith.constant 0 : index
    %c0_0 = arith.constant 0 : index
    %0 = vector.load %arg0[%c0, %c0_0] : memref<1x128xf32, #tpu.memory_space<vmem>>, vector<1x128xf32>
    %cst = arith.constant 2.000000e+01 : f32
    %1 = vector.broadcast %cst : f32 to vector<1x128xf32>
    %2 = arith.cmpf ogt, %0, %1 : vector<1x128xf32>
    %cst_1 = arith.constant 2.000000e+01 : f32
    %3 = vector.broadcast %cst_1 : f32 to vector<1x128xf32>
    %4 = arith.minimumf %0, %3 : vector<1x128xf32>
    %5 = math.exp %4 : vector<1x128xf32>
    %6 = math.log1p %5 : vector<1x128xf32>
    %7 = arith.select %2, %0, %6 : vector<1x128xi1>, vector<1x128xf32>
    %c0_2 = arith.constant 0 : index
    %c0_3 = arith.constant 0 : index
    %8 = vector.load %arg1[%c0_2, %c0_3] : memref<1x128xf32, #tpu.memory_space<vmem>>, vector<1x128xf32>
    tpu.vector_store %arg1[%c0_2, %c0_3], %7 {strides = array<i32>} : memref<1x128xf32, #tpu.memory_space<vmem>>, vector<1x128xf32>,
    return
  }
}

</mosaic_0001>

<bundles_post_ra>
// kernel: tpu_custom_call.1
= control target key start
LH: loop header
LB: loop body
LE: loop exit
PB: predicated region body
PF: predicated region fallthrough
CT: control target
= control target key end

     0   :  { %6 = vsyncpa [#allocation3], 0  ;;  %s142_s0 = inlined_call_operand.hbm [shape: f32[1,128], index: 0, kind: input, shape index: {}]   ;;  %s143_s1 = inlined_call_operand.hbm [shape: f32[1,128], index: 1, kind: output, shape index: {}]  }
   0x1   :  { %7 = vsyncpa [#allocation4], 0  ;;  %s106_s6 = smov [#allocation2]   ;;  %s58_s10 = scalar_lea.hbm %s142_s0, 16 }
   0x2   :  { %s14_s7 = sshll.u32 %s106_s6, 4  ;;  %p59_p0 = scmp.ne.s32.totalorder %s142_s0, %s58_s10  ;;  %s15_s7 = int_to_ptr.vmem [resolvable:$true] %s14_s7 }
   0x3   :  { %p62_p1 = scmp.lt.u32.totalorder %s58_s10, %s142_s0 }
   0x5   :  { %p64_p2 = pnand %p62_p1, %p59_p0 }
   0x7   :  { %67 = shalt.err (!%p64_p2)
}
   0x8   :  { %s68_s15 = scalar_lea.vmem %s15_s7, 16  ;;  %s72_s16 = scalar_lea.vmem %s15_s7, 32 }
   0x9   :  { %p69_p3 = scmp.ne.s32.totalorder %s15_s7, %s68_s15  ;;  %p73_p4 = scmp.lt.s32.totalorder %s15_s7, %s15_s7 }
   0xa   :  { %p74_p5 = scmp.lt.s32.totalorder %s72_s16, %s68_s15 }
   0xc   :  { %p75_p6 = por %p74_p5, %p73_p4 }
   0xe   :  { %p76_p7 = pnand %p75_p6, %p69_p3 }
  0x10   :  { %79 = shalt.err (!%p76_p7)
}
  0x11   :  { %17 = dma.hbm_to_vmem [thread:$0]  %s142_s0, 16, %s15_s7, [#allocation3]  }
  0x12   :  { %102 = dma.done.wait [#allocation3], 16  }
  0x13   :  { %103 = vsyncadd [#allocation3], 4294967280  ;;  %v21_v0 = vld [vmem:[#allocation2] sm:$0x1]  ;;  %s107_s19 = smov [#allocation5]  }
  0x14   :  { %v23_v1 = vmin.f32 %v21_v0, 20.0  ;;  %s43_s20 = sshll.u32 %s107_s19, 4  ;;  %vm22_vm1 = vcmp.gt.f32.partialorder %v21_v0, 20.0  ;;  %s44_s20 = int_to_ptr.vmem [resolvable:$true] %s43_s20 }
  0x15   :  { %s80_s0 = scalar_lea.vmem %s44_s20, 16  ;;  %s84_s21 = scalar_lea.vmem %s44_s20, 32 }
  0x16   :  { %v24_v2 = vmul.f32 1.442695, %v23_v1  ;;  %p81_p8 = scmp.ne.s32.totalorder %s44_s20, %s80_s0  ;;  %p85_p9 = scmp.lt.s32.totalorder %s44_s20, %s44_s20 }
  0x17   :  { %p86_p10 = scmp.lt.s32.totalorder %s84_s21, %s80_s0 }
  0x18   :  { %54 = vpow2.f32 %v24_v2 }
  0x19   :  { %p87_p11 = por %p86_p10, %p85_p9 }
  0x1b   :  { %p88_p12 = pnand %p87_p11, %p81_p8 }
  0x22   :  { %v55_v3 = vpop.eup %54 }
  0x23   :  { %v26_v4 = vadd.f32 1.0, %v55_v3  ;;  %v29_v5 = vmul.f32 -0.5, %v55_v3  ;;  %v32_v7 = vand.u32 2147483647, %v55_v3 }
  0x25   :  { %56 = vlog2.f32 %v26_v4  ;;  %v30_v6 = vadd.f32 1.0, %v29_v5  ;;  %vm33_vm0 = vcmp.lt.f32.partialorder %v32_v7, 0.0004427343 }
  0x27   :  { %v31_v8 = vmul.f32 %v55_v3, %v30_v6 }
  0x2f   :  { %v57_v9 = vpop.eup %56 }
  0x30   :  { %v28_v10 = vmul.f32 0.6931472, %v57_v9 }
  0x32   :  { %v34_v11 = vsel %vm33_vm0, %v31_v8, %v28_v10 }
  0x33   :  { %v35_v12 = vsel %vm22_vm1, %v21_v0, %v34_v11 }
  0x34   :  { %36 = vst [vmem:[#allocation5] sm:$0x1] %v35_v12 }
  0x35   :  { %91 = shalt.err (!%p88_p12)
}
  0x36   :  { %s92_s24 = scalar_lea.hbm %s143_s1, 16 }
  0x37   :  { %p93_p13 = scmp.ne.s32.totalorder %s143_s1, %s92_s24  ;;  %p96_p0 = scmp.lt.u32.totalorder %s92_s24, %s143_s1 }
  0x39   :  { %p98_p1 = pnand %p96_p0, %p93_p13 }
  0x3b   :  { %101 = shalt.err (!%p98_p1)
}
  0x3c   :  { %46 = dma.vmem_to_hbm [thread:$0]  %s44_s20, 16, %s143_s1, [#allocation4]  }
  0x3d   :  { %104 = dma.done.wait [#allocation4], 16  }
  0x3e   :  { %105 = vsyncadd [#allocation4], 4294967280 }
  0x3f   :  { %50 = vsyncpa [#allocation3], 1 }
  0x40   :  { %51 = vsyncpa [#allocation4], 1 }

</bundles_post_ra>
